<compile_context>
chip_gen: v5e
topology: v5e:2x2
jax: 0.10.0
libtpu: 0.0.40
codegen_flags: <defaults>
</compile_context>

<pallas_src>
import functools

import jax
import jax.numpy as jnp
from jax.experimental import pallas as pl
from jax.experimental.pallas import tpu as pltpu


def _decoder_kernel(x_ref, h0_ref, c0_ref, wih_ref, whh_ref, b_ref,
                    wlin_ref, blin_ref,
                    y_ref, hn_ref, cn_ref,
                    h_all_sc, *, seq_len, batch, hidden_size):
    T, B, H = seq_len, batch, hidden_size

    # ---- Hoisted input projection: one matmul for all timesteps. -----------
    # xg: (T*B, 4H) in f32 (gate order [i, f, g, o], PyTorch convention).
    xg = (jnp.dot(x_ref[...], wih_ref[...],
                  preferred_element_type=jnp.float32)
          + b_ref[...])                       # bias broadcast happens once

    whh = whh_ref[...]                        # recurrent weight, loaded once
    h = h0_ref[...].astype(jnp.float32)
    c = c0_ref[...].astype(jnp.float32)

    # ---- Serial recurrence, fully unrolled (T is a static Python int, so ----
    # this is equivalent to lax.fori_loop(0, T, ..., unroll=True); only the
    # h @ W_hh matmul stays on the critical path.
    for t in range(T):
        gates = xg[t * B:(t + 1) * B, :] + jnp.dot(
            h.astype(whh.dtype), whh, preferred_element_type=jnp.float32)
        # NOTE: with H=32 each gate slice is a sub-vreg (32-lane) slice; at
        # realistic sizes make H a multiple of 128 so these are whole-lane views.
        i = jax.nn.sigmoid(gates[:, 0 * H:1 * H])
        f = jax.nn.sigmoid(gates[:, 1 * H:2 * H])
        g = jnp.tanh(gates[:, 2 * H:3 * H])
        o = jax.nn.sigmoid(gates[:, 3 * H:4 * H])
        c = f * c + i * g                     # state math stays f32 (v5e-safe)
        h = o * jnp.tanh(c)
        h_all_sc[t * B:(t + 1) * B, :] = h    # static-offset scratch store

    # ---- Final-state writes: exactly once, after the loop. ------------------
    hn_ref[...] = h.astype(hn_ref.dtype)
    cn_ref[...] = c.astype(cn_ref.dtype)

    # ---- Hoisted output Linear: one matmul + bias, one store of y. ----------
    wlin = wlin_ref[...]
    y_ref[...] = (jnp.dot(h_all_sc[...].astype(wlin.dtype), wlin,
                          preferred_element_type=jnp.float32)
                  + blin_ref[...]).astype(y_ref.dtype)


def decoder_forward(x, hidden, params, compute_dtype=jnp.float32):
    """Pallas implementation of Decoder.forward(x, hidden).

    compute_dtype controls the dtype fed to the MXU (weights / x / h at dot
    time); accumulation is always f32 and gate/state math stays f32.
    """
    h0, c0 = hidden                           # each (1, B, H)
    T, B, E = x.shape
    H = h0.shape[-1]
    O = params["w_lin"].shape[0]
    out_dtype = x.dtype

    # Glue: pre-transpose weights so the kernel does plain row-major matmuls,
    # fuse the two LSTM biases, flatten x to (T*B, E) for the batched
    # input projection.
    w_ih_t = params["w_ih"].T.astype(compute_dtype)                 # (E, 4H)
    w_hh_t = params["w_hh"].T.astype(compute_dtype)                 # (H, 4H)
    b_gate = (params["b_ih"] + params["b_hh"]).reshape(1, 4 * H).astype(jnp.float32)
    w_lin_t = params["w_lin"].T.astype(compute_dtype)               # (H, O)
    b_lin = params["b_lin"].reshape(1, O).astype(jnp.float32)
    x2d = x.reshape(T * B, E).astype(compute_dtype)

    kernel = functools.partial(_decoder_kernel, seq_len=T, batch=B, hidden_size=H)

    def vmem_spec():
        # Whole array resident in VMEM, single-buffered (no grid => no pipelining).
        return pl.BlockSpec(memory_space=pltpu.MemorySpace.VMEM)

    # TODO(synk): for large B on v7x, add a leading "parallel" batch grid axis
    # so each TensorCore runs an independent recurrence; at B=2 it is not worth it.
    y2d, h_n, c_n = pl.pallas_call(
        kernel,
        out_shape=(
            jax.ShapeDtypeStruct((T * B, O), out_dtype),
            jax.ShapeDtypeStruct((B, H), jnp.float32),
            jax.ShapeDtypeStruct((B, H), jnp.float32),
        ),
        in_specs=[vmem_spec() for _ in range(8)],
        out_specs=(vmem_spec(), vmem_spec(), vmem_spec()),
        scratch_shapes=[
            pltpu.VMEM((T * B, H), jnp.float32),   # h_t history for the output Linear
        ],
        compiler_params=pltpu.CompilerParams(
            vmem_limit_bytes=64 * 1024 * 1024,
        ),
    )(x2d, h0[0], c0[0], w_ih_t, w_hh_t, b_gate, w_lin_t, b_lin)

    y = y2d.reshape(T, B, O)
    return y, (h_n[None], c_n[None])


def decoder_reference(x, hidden, params):
    """Pure-JAX reference matching PyTorch LSTM + Linear semantics (f32)."""
    h0, c0 = hidden
    H = h0.shape[-1]
    w_ih, w_hh = params["w_ih"], params["w_hh"]
    b = params["b_ih"] + params["b_hh"]

    def step(carry, x_t):
        h, c = carry
        gates = x_t @ w_ih.T + h @ w_hh.T + b
        i = jax.nn.sigmoid(gates[:, 0 * H:1 * H])
        f = jax.nn.sigmoid(gates[:, 1 * H:2 * H])
        g = jnp.tanh(gates[:, 2 * H:3 * H])
        o = jax.nn.sigmoid(gates[:, 3 * H:4 * H])
        c = f * c + i * g
        h = o * jnp.tanh(c)
        return (h, c), h

    (h_n, c_n), hs = jax.lax.scan(step, (h0[0], c0[0]), x)
    y = hs @ params["w_lin"].T + params["b_lin"]
    return y, (h_n[None], c_n[None])


def init_params(key, hidden_size, output_size):
    """Deterministic init with PyTorch-style U(-1/sqrt(H), 1/sqrt(H))."""
    ks = jax.random.split(key, 6)
    k = 1.0 / jnp.sqrt(hidden_size)
    u = lambda kk, shape: jax.random.uniform(kk, shape, jnp.float32, -k, k)
    return {
        "w_ih": u(ks[0], (4 * hidden_size, output_size)),
        "w_hh": u(ks[1], (4 * hidden_size, hidden_size)),
        "b_ih": u(ks[2], (4 * hidden_size,)),
        "b_hh": u(ks[3], (4 * hidden_size,)),
        "w_lin": u(ks[4], (output_size, hidden_size)),
        "b_lin": u(ks[5], (output_size,)),
    }


if __name__ == "__main__":
    seq_len, batch, hidden_size, output_size = 8, 2, 32, 8

    key = jax.random.PRNGKey(0)
    k_params, k_x = jax.random.split(key)

    params = init_params(k_params, hidden_size, output_size)
    x = jax.random.normal(k_x, (seq_len, batch, output_size), jnp.float32)
    # init_hidden(batch_size): zeros of shape (1, batch, hidden_size)
    hidden = (
        jnp.zeros((1, batch, hidden_size), jnp.float32),
        jnp.zeros((1, batch, hidden_size), jnp.float32),
    )

    # Full-precision path: must match the PyTorch-semantics reference tightly.
    y, (h_n, c_n) = decoder_forward(x, hidden, params)
    jax.block_until_ready((y, h_n, c_n))

    y_ref, (h_ref, c_ref) = decoder_reference(x, hidden, params)
    assert y.shape == (seq_len, batch, output_size)
    assert h_n.shape == (1, batch, hidden_size) and c_n.shape == (1, batch, hidden_size)
    assert jnp.allclose(y, y_ref, atol=1e-3, rtol=1e-3)
    assert jnp.allclose(h_n, h_ref, atol=1e-3, rtol=1e-3)
    assert jnp.allclose(c_n, c_ref, atol=1e-3, rtol=1e-3)

    # bf16-weights path (MXU-friendly at realistic sizes); loose tolerance.
    y_bf, (h_bf, c_bf) = decoder_forward(x, hidden, params, compute_dtype=jnp.bfloat16)
    jax.block_until_ready((y_bf, h_bf, c_bf))
    assert y_bf.shape == (seq_len, batch, output_size)
    assert bool(jnp.all(jnp.isfinite(y_bf)))
    assert jnp.allclose(y_bf.astype(jnp.float32), y_ref, atol=1e-1, rtol=1e-1)

    print("KERNEL_OK")
</pallas_src>

<mosaic_0001>
module attributes {stable_mosaic.version = 11 : i64} {
  func.func @_decoder_kernel(%arg0: memref<16x8xf32, #tpu.memory_space<vmem>>, %arg1: memref<2x32xf32, #tpu.memory_space<vmem>>, %arg2: memref<2x32xf32, #tpu.memory_space<vmem>>, %arg3: memref<8x128xf32, #tpu.memory_space<vmem>>, %arg4: memref<32x128xf32, #tpu.memory_space<vmem>>, %arg5: memref<1x128xf32, #tpu.memory_space<vmem>>, %arg6: memref<32x8xf32, #tpu.memory_space<vmem>>, %arg7: memref<1x8xf32, #tpu.memory_space<vmem>>, %arg8: memref<16x8xf32, #tpu.memory_space<vmem>>, %arg9: memref<2x32xf32, #tpu.memory_space<vmem>>, %arg10: memref<2x32xf32, #tpu.memory_space<vmem>>, %arg11: memref<16x32xf32, #tpu.memory_space<vmem>>) attributes {dimension_semantics = [], scalar_prefetch = 0 : i64, scratch_operands = 1 : i64, tpu.core_type = #tpu.core_type<tc>} {
    %c0 = arith.constant 0 : index
    %c0_0 = arith.constant 0 : index
    %0 = vector.load %arg0[%c0, %c0_0] : memref<16x8xf32, #tpu.memory_space<vmem>>, vector<16x8xf32>
    %c0_1 = arith.constant 0 : index
    %c0_2 = arith.constant 0 : index
    %1 = vector.load %arg3[%c0_1, %c0_2] : memref<8x128xf32, #tpu.memory_space<vmem>>, vector<8x128xf32>
    %cst = arith.constant dense<0.000000e+00> : vector<16x128xf32>
    %2 = tpu.matmul %0, %1, %cst {dimension_numbers = #tpu.dot_dimension_numbers<[1], [0], [0], [1], [0, 0, 1, 1], [], []>} : vector<16x8xf32>, vector<8x128xf32>, vector<16x128xf32> -> vector<16x128xf32>
    %c0_3 = arith.constant 0 : index
    %c0_4 = arith.constant 0 : index
    %3 = vector.load %arg5[%c0_3, %c0_4] : memref<1x128xf32, #tpu.memory_space<vmem>>, vector<1x128xf32>
    %4 = vector.broadcast %3 : vector<1x128xf32> to vector<16x128xf32>
    %5 = arith.addf %2, %4 : vector<16x128xf32>
    %c0_5 = arith.constant 0 : index
    %c0_6 = arith.constant 0 : index
    %6 = vector.load %arg4[%c0_5, %c0_6] : memref<32x128xf32, #tpu.memory_space<vmem>>, vector<32x128xf32>
    %c0_7 = arith.constant 0 : index
    %c0_8 = arith.constant 0 : index
    %7 = vector.load %arg1[%c0_7, %c0_8] : memref<2x32xf32, #tpu.memory_space<vmem>>, vector<2x32xf32>
    %c0_9 = arith.constant 0 : index
    %c0_10 = arith.constant 0 : index
    %8 = vector.load %arg2[%c0_9, %c0_10] : memref<2x32xf32, #tpu.memory_space<vmem>>, vector<2x32xf32>
    %9 = vector.extract_strided_slice %5 {offsets = [0, 0], sizes = [2, 128], strides = [1, 1]} : vector<16x128xf32> to vector<2x128xf32>
    %cst_11 = arith.constant dense<0.000000e+00> : vector<2x128xf32>
    %10 = tpu.matmul %7, %6, %cst_11 {dimension_numbers = #tpu.dot_dimension_numbers<[1], [0], [0], [1], [0, 0, 1, 1], [], []>} : vector<2x32xf32>, vector<32x128xf32>, vector<2x128xf32> -> vector<2x128xf32>
    %11 = arith.addf %9, %10 : vector<2x128xf32>
    %12 = vector.extract_strided_slice %11 {offsets = [0, 0], sizes = [2, 32], strides = [1, 1]} : vector<2x128xf32> to vector<2x32xf32>
    %13 = arith.negf %12 : vector<2x32xf32>
    %14 = math.exp %13 : vector<2x32xf32>
    %cst_12 = arith.constant 1.000000e+00 : f32
    %15 = vector.broadcast %cst_12 : f32 to vector<2x32xf32>
    %16 = arith.addf %15, %14 : vector<2x32xf32>
    %17 = arith.divf %15, %16 : vector<2x32xf32>
    %18 = vector.extract_strided_slice %11 {offsets = [0, 32], sizes = [2, 32], strides = [1, 1]} : vector<2x128xf32> to vector<2x32xf32>
    %19 = arith.negf %18 : vector<2x32xf32>
    %20 = math.exp %19 : vector<2x32xf32>
    %cst_13 = arith.constant 1.000000e+00 : f32
    %21 = vector.broadcast %cst_13 : f32 to vector<2x32xf32>
    %22 = arith.addf %21, %20 : vector<2x32xf32>
    %23 = arith.divf %21, %22 : vector<2x32xf32>
    %24 = vector.extract_strided_slice %11 {offsets = [0, 64], sizes = [2, 32], strides = [1, 1]} : vector<2x128xf32> to vector<2x32xf32>
    %25 = math.tanh %24 : vector<2x32xf32>
    %26 = vector.extract_strided_slice %11 {offsets = [0, 96], sizes = [2, 32], strides = [1, 1]} : vector<2x128xf32> to vector<2x32xf32>
    %27 = arith.negf %26 : vector<2x32xf32>
    %28 = math.exp %27 : vector<2x32xf32>
    %cst_14 = arith.constant 1.000000e+00 : f32
    %29 = vector.broadcast %cst_14 : f32 to vector<2x32xf32>
    %30 = arith.addf %29, %28 : vector<2x32xf32>
    %31 = arith.divf %29, %30 : vector<2x32xf32>
    %32 = arith.mulf %23, %8 : vector<2x32xf32>
    %33 = arith.mulf %17, %25 : vector<2x32xf32>
    %34 = arith.addf %32, %33 : vector<2x32xf32>
    %35 = math.tanh %34 : vector<2x32xf32>
    %36 = arith.mulf %31, %35 : vector<2x32xf32>
    %c0_15 = arith.constant 0 : index
    %c0_16 = arith.constant 0 : index
    %37 = vector.load %arg11[%c0_15, %c0_16] : memref<16x32xf32, #tpu.memory_space<vmem>>, vector<2x32xf32>
    tpu.vector_store %arg11[%c0_15, %c0_16], %36 {strides = array<i32>} : memref<16x32xf32, #tpu.memory_space<vmem>>, vector<2x32xf32>,
    %38 = vector.extract_strided_slice %5 {offsets = [2, 0], sizes = [2, 128], strides = [1, 1]} : vector<16x128xf32> to vector<2x128xf32>
    %cst_17 = arith.constant dense<0.000000e+00> : vector<2x128xf32>
    %39 = tpu.matmul %36, %6, %cst_17 {dimension_numbers = #tpu.dot_dimension_numbers<[1], [0], [0], [1], [0, 0, 1, 1], [], []>} : vector<2x32xf32>, vector<32x128xf32>, vector<2x128xf32> -> vector<2x128xf32>
    %40 = arith.addf %38, %39 : vector<2x128xf32>
    %41 = vector.extract_strided_slice %40 {offsets = [0, 0], sizes = [2, 32], strides = [1, 1]} : vector<2x128xf32> to vector<2x32xf32>
    %42 = arith.negf %41 : vector<2x32xf32>
    %43 = math.exp %42 : vector<2x32xf32>
    %cst_18 = arith.constant 1.000000e+00 : f32
    %44 = vector.broadcast %cst_18 : f32 to vector<2x32xf32>
    %45 = arith.addf %44, %43 : vector<2x32xf32>
    %46 = arith.divf %44, %45 : vector<2x32xf32>
    %47 = vector.extract_strided_slice %40 {offsets = [0, 32], sizes = [2, 32], strides = [1, 1]} : vector<2x128xf32> to vector<2x32xf32>
    %48 = arith.negf %47 : vector<2x32xf32>
    %49 = math.exp %48 : vector<2x32xf32>
    %cst_19 = arith.constant 1.000000e+00 : f32
    %50 = vector.broadcast %cst_19 : f32 to vector<2x32xf32>
    %51 = arith.addf %50, %49 : vector<2x32xf32>
    %52 = arith.divf %50, %51 : vector<2x32xf32>
    %53 = vector.extract_strided_slice %40 {offsets = [0, 64], sizes = [2, 32], strides = [1, 1]} : vector<2x128xf32> to vector<2x32xf32>
    %54 = math.tanh %53 : vector<2x32xf32>
    %55 = vector.extract_strided_slice %40 {offsets = [0, 96], sizes = [2, 32], strides = [1, 1]} : vector<2x128xf32> to vector<2x32xf32>
    %56 = arith.negf %55 : vector<2x32xf32>
    %57 = math.exp %56 : vector<2x32xf32>
    %cst_20 = arith.constant 1.000000e+00 : f32
    %58 = vector.broadcast %cst_20 : f32 to vector<2x32xf32>
    %59 = arith.addf %58, %57 : vector<2x32xf32>
    %60 = arith.divf %58, %59 : vector<2x32xf32>
    %61 = arith.mulf %52, %34 : vector<2x32xf32>
    %62 = arith.mulf %46, %54 : vector<2x32xf32>
    %63 = arith.addf %61, %62 : vector<2x32xf32>
    %64 = math.tanh %63 : vector<2x32xf32>
    %65 = arith.mulf %60, %64 : vector<2x32xf32>
    %c2 = arith.constant 2 : index
    %c0_21 = arith.constant 0 : index
    %66 = vector.load %arg11[%c2, %c0_21] : memref<16x32xf32, #tpu.memory_space<vmem>>, vector<2x32xf32>
    tpu.vector_store %arg11[%c2, %c0_21], %65 {strides = array<i32>} : memref<16x32xf32, #tpu.memory_space<vmem>>, vector<2x32xf32>,
    %67 = vector.extract_strided_slice %5 {offsets = [4, 0], sizes = [2, 128], strides = [1, 1]} : vector<16x128xf32> to vector<2x128xf32>
    %cst_22 = arith.constant dense<0.000000e+00> : vector<2x128xf32>
    %68 = tpu.matmul %65, %6, %cst_22 {dimension_numbers = #tpu.dot_dimension_numbers<[1], [0], [0], [1], [0, 0, 1, 1], [], []>} : vector<2x32xf32>, vector<32x128xf32>, vector<2x128xf32> -> vector<2x128xf32>
    %69 = arith.addf %67, %68 : vector<2x128xf32>
    %70 = vector.extract_strided_slice %69 {offsets = [0, 0], sizes = [2, 32], strides = [1, 1]} : vector<2x128xf32> to vector<2x32xf32>
    %71 = arith.negf %70 : vector<2x32xf32>
    %72 = math.exp %71 : vector<2x32xf32>
    %cst_23 = arith.constant 1.000000e+00 : f32
    %73 = vector.broadcast %cst_23 : f32 to vector<2x32xf32>
    %74 = arith.addf %73, %72 : vector<2x32xf32>
    %75 = arith.divf %73, %74 : vector<2x32xf32>
    %76 = vector.extract_strided_slice %69 {offsets = [0, 32], sizes = [2, 32], strides = [1, 1]} : vector<2x128xf32> to vector<2x32xf32>
    %77 = arith.negf %76 : vector<2x32xf32>
    %78 = math.exp %77 : vector<2x32xf32>
    %cst_24 = arith.constant 1.000000e+00 : f32
    %79 = vector.broadcast %cst_24 : f32 to vector<2x32xf32>
    %80 = arith.addf %79, %78 : vector<2x32xf32>
    %81 = arith.divf %79, %80 : vector<2x32xf32>
    %82 = vector.extract_strided_slice %69 {offsets = [0, 64], sizes = [2, 32], strides = [1, 1]} : vector<2x128xf32> to vector<2x32xf32>
    %83 = math.tanh %82 : vector<2x32xf32>
    %84 = vector.extract_strided_slice %69 {offsets = [0, 96], sizes = [2, 32], strides = [1, 1]} : vector<2x128xf32> to vector<2x32xf32>
    %85 = arith.negf %84 : vector<2x32xf32>
    %86 = math.exp %85 : vector<2x32xf32>
    %cst_25 = arith.constant 1.000000e+00 : f32
    %87 = vector.broadcast %cst_25 : f32 to vector<2x32xf32>
    %88 = arith.addf %87, %86 : vector<2x32xf32>
    %89 = arith.divf %87, %88 : vector<2x32xf32>
    %90 = arith.mulf %81, %63 : vector<2x32xf32>
    %91 = arith.mulf %75, %83 : vector<2x32xf32>
    %92 = arith.addf %90, %91 : vector<2x32xf32>
    %93 = math.tanh %92 : vector<2x32xf32>
    %94 = arith.mulf %89, %93 : vector<2x32xf32>
    %c4 = arith.constant 4 : index
    %c0_26 = arith.constant 0 : index
    %95 = vector.load %arg11[%c4, %c0_26] : memref<16x32xf32, #tpu.memory_space<vmem>>, vector<2x32xf32>
    tpu.vector_store %arg11[%c4, %c0_26], %94 {strides = array<i32>} : memref<16x32xf32, #tpu.memory_space<vmem>>, vector<2x32xf32>,
    %96 = vector.extract_strided_slice %5 {offsets = [6, 0], sizes = [2, 128], strides = [1, 1]} : vector<16x128xf32> to vector<2x128xf32>
    %cst_27 = arith.constant dense<0.000000e+00> : vector<2x128xf32>
    %97 = tpu.matmul %94, %6, %cst_27 {dimension_numbers = #tpu.dot_dimension_numbers<[1], [0], [0], [1], [0, 0, 1, 1], [], []>} : vector<2x32xf32>, vector<32x128xf32>, vector<2x128xf32> -> vector<2x128xf32>
    %98 = arith.addf %96, %97 : vector<2x128xf32>
    %99 = vector.extract_strided_slice %98 {offsets = [0, 0], sizes = [2, 32], strides = [1, 1]} : vector<2x128xf32> to vector<2x32xf32>
    %100 = arith.negf %99 : vector<2x32xf32>
    %101 = math.exp %100 : vector<2x32xf32>
    %cst_28 = arith.constant 1.000000e+00 : f32
    %102 = vector.broadcast %cst_28 : f32 to vector<2x32xf32>
    %103 = arith.addf %102, %101 : vector<2x32xf32>
    %104 = arith.divf %102, %103 : vector<2x32xf32>
    %105 = vector.extract_strided_slice %98 {offsets = [0, 32], sizes = [2, 32], strides = [1, 1]} : vector<2x128xf32> to vector<2x32xf32>
    %106 = arith.negf %105 : vector<2x32xf32>
    %107 = math.exp %106 : vector<2x32xf32>
    %cst_29 = arith.constant 1.000000e+00 : f32
    %108 = vector.broadcast %cst_29 : f32 to vector<2x32xf32>
    %109 = arith.addf %108, %107 : vector<2x32xf32>
    %110 = arith.divf %108, %109 : vector<2x32xf32>
    %111 = vector.extract_strided_slice %98 {offsets = [0, 64], sizes = [2, 32], strides = [1, 1]} : vector<2x128xf32> to vector<2x32xf32>
    %112 = math.tanh %111 : vector<2x32xf32>
    %113 = vector.extract_strided_slice %98 {offsets = [0, 96], sizes = [2, 32], strides = [1, 1]} : vector<2x128xf32> to vector<2x32xf32>
    %114 = arith.negf %113 : vector<2x32xf32>
    %115 = math.exp %114 : vector<2x32xf32>
    %cst_30 = arith.constant 1.000000e+00 : f32
    %116 = vector.broadcast %cst_30 : f32 to vector<2x32xf32>
    %117 = arith.addf %116, %115 : vector<2x32xf32>
    %118 = arith.divf %116, %117 : vector<2x32xf32>
    %119 = arith.mulf %110, %92 : vector<2x32xf32>
    %120 = arith.mulf %104, %112 : vector<2x32xf32>
    %121 = arith.addf %119, %120 : vector<2x32xf32>
    %122 = math.tanh %121 : vector<2x32xf32>
    %123 = arith.mulf %118, %122 : vector<2x32xf32>
    %c6 = arith.constant 6 : index
    %c0_31 = arith.constant 0 : index
    %124 = vector.load %arg11[%c6, %c0_31] : memref<16x32xf32, #tpu.memory_space<vmem>>, vector<2x32xf32>
    tpu.vector_store %arg11[%c6, %c0_31], %123 {strides = array<i32>} : memref<16x32xf32, #tpu.memory_space<vmem>>, vector<2x32xf32>,
    %125 = vector.extract_strided_slice %5 {offsets = [8, 0], sizes = [2, 128], strides = [1, 1]} : vector<16x128xf32> to vector<2x128xf32>
    %cst_32 = arith.constant dense<0.000000e+00> : vector<2x128xf32>
    %126 = tpu.matmul %123, %6, %cst_32 {dimension_numbers = #tpu.dot_dimension_numbers<[1], [0], [0], [1], [0, 0, 1, 1], [], []>} : vector<2x32xf32>, vector<32x128xf32>, vector<2x128xf32> -> vector<2x128xf32>
    %127 = arith.addf %125, %126 : vector<2x128xf32>
    %128 = vector.extract_strided_slice %127 {offsets = [0, 0], sizes = [2, 32], strides = [1, 1]} : vector<2x128xf32> to vector<2x32xf32>
    %129 = arith.negf %128 : vector<2x32xf32>
    %130 = math.exp %129 : vector<2x32xf32>
    %cst_33 = arith.constant 1.000000e+00 : f32
    %131 = vector.broadcast %cst_33 : f32 to vector<2x32xf32>
    %132 = arith.addf %131, %130 : vector<2x32xf32>
    %133 = arith.divf %131, %132 : vector<2x32xf32>
    %134 = vector.extract_strided_slice %127 {offsets = [0, 32], sizes = [2, 32], strides = [1, 1]} : vector<2x128xf32> to vector<2x32xf32>
    %135 = arith.negf %134 : vector<2x32xf32>
    %136 = math.exp %135 : vector<2x32xf32>
    %cst_34 = arith.constant 1.000000e+00 : f32
    %137 = vector.broadcast %cst_34 : f32 to vector<2x32xf32>
    %138 = arith.addf %137, %136 : vector<2x32xf32>
    %139 = arith.divf %137, %138 : vector<2x32xf32>
    %140 = vector.extract_strided_slice %127 {offsets = [0, 64], sizes = [2, 32], strides = [1, 1]} : vector<2x128xf32> to vector<2x32xf32>
    %141 = math.tanh %140 : vector<2x32xf32>
    %142 = vector.extract_strided_slice %127 {offsets = [0, 96], sizes = [2, 32], strides = [1, 1]} : vector<2x128xf32> to vector<2x32xf32>
    %143 = arith.negf %142 : vector<2x32xf32>
    %144 = math.exp %143 : vector<2x32xf32>
    %cst_35 = arith.constant 1.000000e+00 : f32
    %145 = vector.broadcast %cst_35 : f32 to vector<2x32xf32>
    %146 = arith.addf %145, %144 : vector<2x32xf32>
    %147 = arith.divf %145, %146 : vector<2x32xf32>
    %148 = arith.mulf %139, %121 : vector<2x32xf32>
    %149 = arith.mulf %133, %141 : vector<2x32xf32>
    %150 = arith.addf %148, %149 : vector<2x32xf32>
    %151 = math.tanh %150 : vector<2x32xf32>
    %152 = arith.mulf %147, %151 : vector<2x32xf32>
    %c8 = arith.constant 8 : index
    %c0_36 = arith.constant 0 : index
    %153 = vector.load %arg11[%c8, %c0_36] : memref<16x32xf32, #tpu.memory_space<vmem>>, vector<2x32xf32>
    tpu.vector_store %arg11[%c8, %c0_36], %152 {strides = array<i32>} : memref<16x32xf32, #tpu.memory_space<vmem>>, vector<2x32xf32>,
    %154 = vector.extract_strided_slice %5 {offsets = [10, 0], sizes = [2, 128], strides = [1, 1]} : vector<16x128xf32> to vector<2x128xf32>
    %cst_37 = arith.constant dense<0.000000e+00> : vector<2x128xf32>
    %155 = tpu.matmul %152, %6, %cst_37 {dimension_numbers = #tpu.dot_dimension_numbers<[1], [0], [0], [1], [0, 0, 1, 1], [], []>} : vector<2x32xf32>, vector<32x128xf32>, vector<2x128xf32> -> vector<2x128xf32>
    %156 = arith.addf %154, %155 : vector<2x128xf32>
    %157 = vector.extract_strided_slice %156 {offsets = [0, 0], sizes = [2, 32], strides = [1, 1]} : vector<2x128xf32> to vector<2x32xf32>
    %158 = arith.negf %157 : vector<2x32xf32>
    %159 = math.exp %158 : vector<2x32xf32>
    %cst_38 = arith.constant 1.000000e+00 : f32
    %160 = vector.broadcast %cst_38 : f32 to vector<2x32xf32>
    %161 = arith.addf %160, %159 : vector<2x32xf32>
    %162 = arith.divf %160, %161 : vector<2x32xf32>
    %163 = vector.extract_strided_slice %156 {offsets = [0, 32], sizes = [2, 32], strides = [1, 1]} : vector<2x128xf32> to vector<2x32xf32>
    %164 = arith.negf %163 : vector<2x32xf32>
    %165 = math.exp %164 : vector<2x32xf32>
    %cst_39 = arith.constant 1.000000e+00 : f32
    %166 = vector.broadcast %cst_39 : f32 to vector<2x32xf32>
    %167 = arith.addf %166, %165 : vector<2x32xf32>
    %168 = arith.divf %166, %167 : vector<2x32xf32>
    %169 = vector.extract_strided_slice %156 {offsets = [0, 64], sizes = [2, 32], strides = [1, 1]} : vector<2x128xf32> to vector<2x32xf32>
    %170 = math.tanh %169 : vector<2x32xf32>
    %171 = vector.extract_strided_slice %156 {offsets = [0, 96], sizes = [2, 32], strides = [1, 1]} : vector<2x128xf32> to vector<2x32xf32>
    %172 = arith.negf %171 : vector<2x32xf32>
    %173 = math.exp %172 : vector<2x32xf32>
    %cst_40 = arith.constant 1.000000e+00 : f32
    %174 = vector.broadcast %cst_40 : f32 to vector<2x32xf32>
    %175 = arith.addf %174, %173 : vector<2x32xf32>
    %176 = arith.divf %174, %175 : vector<2x32xf32>
    %177 = arith.mulf %168, %150 : vector<2x32xf32>
    %178 = arith.mulf %162, %170 : vector<2x32xf32>
    %179 = arith.addf %177, %178 : vector<2x32xf32>
    %180 = math.tanh %179 : vector<2x32xf32>
    %181 = arith.mulf %176, %180 : vector<2x32xf32>
    %c10 = arith.constant 10 : index
    %c0_41 = arith.constant 0 : index
    %182 = vector.load %arg11[%c10, %c0_41] : memref<16x32xf32, #tpu.memory_space<vmem>>, vector<2x32xf32>
    tpu.vector_store %arg11[%c10, %c0_41], %181 {strides = array<i32>} : memref<16x32xf32, #tpu.memory_space<vmem>>, vector<2x32xf32>,
    %183 = vector.extract_strided_slice %5 {offsets = [12, 0], sizes = [2, 128], strides = [1, 1]} : vector<16x128xf32> to vector<2x128xf32>
    %cst_42 = arith.constant dense<0.000000e+00> : vector<2x128xf32>
    %184 = tpu.matmul %181, %6, %cst_42 {dimension_numbers = #tpu.dot_dimension_numbers<[1], [0], [0], [1], [0, 0, 1, 1], [], []>} : vector<2x32xf32>, vector<32x128xf32>, vector<2x128xf32> -> vector<2x128xf32>
    %185 = arith.addf %183, %184 : vector<2x128xf32>
    %186 = vector.extract_strided_slice %185 {offsets = [0, 0], sizes = [2, 32], strides = [1, 1]} : vector<2x128xf32> to vector<2x32xf32>
    %187 = arith.negf %186 : vector<2x32xf32>
    %188 = math.exp %187 : vector<2x32xf32>
    %cst_43 = arith.constant 1.000000e+00 : f32
    %189 = vector.broadcast %cst_43 : f32 to vector<2x32xf32>
    %190 = arith.addf %189, %188 : vector<2x32xf32>
    %191 = arith.divf %189, %190 : vector<2x32xf32>
    %192 = vector.extract_strided_slice %185 {offsets = [0, 32], sizes = [2, 32], strides = [1, 1]} : vector<2x128xf32> to vector<2x32xf32>
    %193 = arith.negf %192 : vector<2x32xf32>
    %194 = math.exp %193 : vector<2x32xf32>
    %cst_44 = arith.constant 1.000000e+00 : f32
    %195 = vector.broadcast %cst_44 : f32 to vector<2x32xf32>
    %196 = arith.addf %195, %194 : vector<2x32xf32>
    %197 = arith.divf %195, %196 : vector<2x32xf32>
    %198 = vector.extract_strided_slice %185 {offsets = [0, 64], sizes = [2, 32], strides = [1, 1]} : vector<2x128xf32> to vector<2x32xf32>
    %199 = math.tanh %198 : vector<2x32xf32>
    %200 = vector.extract_strided_slice %185 {offsets = [0, 96], sizes = [2, 32], strides = [1, 1]} : vector<2x128xf32> to vector<2x32xf32>
    %201 = arith.negf %200 : vector<2x32xf32>
    %202 = math.exp %201 : vector<2x32xf32>
    %cst_45 = arith.constant 1.000000e+00 : f32
    %203 = vector.broadcast %cst_45 : f32 to vector<2x32xf32>
    %204 = arith.addf %203, %202 : vector<2x32xf32>
    %205 = arith.divf %203, %204 : vector<2x32xf32>
    %206 = arith.mulf %197, %179 : vector<2x32xf32>
    %207 = arith.mulf %191, %199 : vector<2x32xf32>
    %208 = arith.addf %206, %207 : vector<2x32xf32>
    %209 = math.tanh %208 : vector<2x32xf32>
    %210 = arith.mulf %205, %209 : vector<2x32xf32>
    %c12 = arith.constant 12 : index
    %c0_46 = arith.constant 0 : index
    %211 = vector.load %arg11[%c12, %c0_46] : memref<16x32xf32, #tpu.memory_space<vmem>>, vector<2x32xf32>
    tpu.vector_store %arg11[%c12, %c0_46], %210 {strides = array<i32>} : memref<16x32xf32, #tpu.memory_space<vmem>>, vector<2x32xf32>,
    %212 = vector.extract_strided_slice %5 {offsets = [14, 0], sizes = [2, 128], strides = [1, 1]} : vector<16x128xf32> to vector<2x128xf32>
    %cst_47 = arith.constant dense<0.000000e+00> : vector<2x128xf32>
    %213 = tpu.matmul %210, %6, %cst_47 {dimension_numbers = #tpu.dot_dimension_numbers<[1], [0], [0], [1], [0, 0, 1, 1], [], []>} : vector<2x32xf32>, vector<32x128xf32>, vector<2x128xf32> -> vector<2x128xf32>
    %214 = arith.addf %212, %213 : vector<2x128xf32>
    %215 = vector.extract_strided_slice %214 {offsets = [0, 0], sizes = [2, 32], strides = [1, 1]} : vector<2x128xf32> to vector<2x32xf32>
    %216 = arith.negf %215 : vector<2x32xf32>
    %217 = math.exp %216 : vector<2x32xf32>
    %cst_48 = arith.constant 1.000000e+00 : f32
    %218 = vector.broadcast %cst_48 : f32 to vector<2x32xf32>
    %219 = arith.addf %218, %217 : vector<2x32xf32>
    %220 = arith.divf %218, %219 : vector<2x32xf32>
    %221 = vector.extract_strided_slice %214 {offsets = [0, 32], sizes = [2, 32], strides = [1, 1]} : vector<2x128xf32> to vector<2x32xf32>
    %222 = arith.negf %221 : vector<2x32xf32>
    %223 = math.exp %222 : vector<2x32xf32>
    %cst_49 = arith.constant 1.000000e+00 : f32
    %224 = vector.broadcast %cst_49 : f32 to vector<2x32xf32>
    %225 = arith.addf %224, %223 : vector<2x32xf32>
    %226 = arith.divf %224, %225 : vector<2x32xf32>
    %227 = vector.extract_strided_slice %214 {offsets = [0, 64], sizes = [2, 32], strides = [1, 1]} : vector<2x128xf32> to vector<2x32xf32>
    %228 = math.tanh %227 : vector<2x32xf32>
    %229 = vector.extract_strided_slice %214 {offsets = [0, 96], sizes = [2, 32], strides = [1, 1]} : vector<2x128xf32> to vector<2x32xf32>
    %230 = arith.negf %229 : vector<2x32xf32>
    %231 = math.exp %230 : vector<2x32xf32>
    %cst_50 = arith.constant 1.000000e+00 : f32
    %232 = vector.broadcast %cst_50 : f32 to vector<2x32xf32>
    %233 = arith.addf %232, %231 : vector<2x32xf32>
    %234 = arith.divf %232, %233 : vector<2x32xf32>
    %235 = arith.mulf %226, %208 : vector<2x32xf32>
    %236 = arith.mulf %220, %228 : vector<2x32xf32>
    %237 = arith.addf %235, %236 : vector<2x32xf32>
    %238 = math.tanh %237 : vector<2x32xf32>
    %239 = arith.mulf %234, %238 : vector<2x32xf32>
    %c14 = arith.constant 14 : index
    %c0_51 = arith.constant 0 : index
    %240 = vector.load %arg11[%c14, %c0_51] : memref<16x32xf32, #tpu.memory_space<vmem>>, vector<2x32xf32>
    tpu.vector_store %arg11[%c14, %c0_51], %239 {strides = array<i32>} : memref<16x32xf32, #tpu.memory_space<vmem>>, vector<2x32xf32>,
    %c0_52 = arith.constant 0 : index
    %c0_53 = arith.constant 0 : index
    %241 = vector.load %arg9[%c0_52, %c0_53] : memref<2x32xf32, #tpu.memory_space<vmem>>, vector<2x32xf32>
    tpu.vector_store %arg9[%c0_52, %c0_53], %239 {strides = array<i32>} : memref<2x32xf32, #tpu.memory_space<vmem>>, vector<2x32xf32>,
    %c0_54 = arith.constant 0 : index
    %c0_55 = arith.constant 0 : index
    %242 = vector.load %arg10[%c0_54, %c0_55] : memref<2x32xf32, #tpu.memory_space<vmem>>, vector<2x32xf32>
    tpu.vector_store %arg10[%c0_54, %c0_55], %237 {strides = array<i32>} : memref<2x32xf32, #tpu.memory_space<vmem>>, vector<2x32xf32>,
    %c0_56 = arith.constant 0 : index
    %c0_57 = arith.constant 0 : index
    %243 = vector.load %arg6[%c0_56, %c0_57] : memref<32x8xf32, #tpu.memory_space<vmem>>, vector<32x8xf32>
    %c0_58 = arith.constant 0 : index
    %c0_59 = arith.constant 0 : index
    %244 = vector.load %arg11[%c0_58, %c0_59] : memref<16x32xf32, #tpu.memory_space<vmem>>, vector<16x32xf32>
    %cst_60 = arith.constant dense<0.000000e+00> : vector<16x8xf32>
    %245 = tpu.matmul %244, %243, %cst_60 {dimension_numbers = #tpu.dot_dimension_numbers<[1], [0], [0], [1], [0, 0, 1, 1], [], []>} : vector<16x32xf32>, vector<32x8xf32>, vector<16x8xf32> -> vector<16x8xf32>
    %c0_61 = arith.constant 0 : index
    %c0_62 = arith.constant 0 : index
    %246 = vector.load %arg7[%c0_61, %c0_62] : memref<1x8xf32, #tpu.memory_space<vmem>>, vector<1x8xf32>
    %247 = vector.broadcast %246 : vector<1x8xf32> to vector<16x8xf32>
    %248 = arith.addf %245, %247 : vector<16x8xf32>
    %c0_63 = arith.constant 0 : index
    %c0_64 = arith.constant 0 : index
    %249 = vector.load %arg8[%c0_63, %c0_64] : memref<16x8xf32, #tpu.memory_space<vmem>>, vector<16x8xf32>
    tpu.vector_store %arg8[%c0_63, %c0_64], %248 {strides = array<i32>} : memref<16x8xf32, #tpu.memory_space<vmem>>, vector<16x8xf32>,
    return
  }
}

</mosaic_0001>

<bundles_post_ra>
// kernel: tpu_custom_call.1
= control target key start
LH: loop header
LB: loop body
LE: loop exit
PB: predicated region body
PF: predicated region fallthrough
CT: control target
= control target key end

     0   :  { %16 = vsyncpa [#allocation4], 0  ;;  %vm41_vm0 = vcmask 64512   ;;  %s1130_s0 = inlined_call_operand.vmem [shape: f32[16,8], index: 0, kind: input, shape index: {}]   ;;  %s1131_s1 = inlined_call_operand.vmem [shape: f32[2,32], index: 1, kind: input, shape index: {}]   ;;  %s1132_s2 = inlined_call_operand.vmem [shape: f32[2,32], index: 2, kind: input, shape index: {}]   ;;  %s1133_s3 = inlined_call_operand.vmem [shape: f32[8,128], index: 3, kind: input, shape index: {}]   ;;  %s1134_s4 = inlined_call_operand.vmem [shape: f32[32,128], index: 4, kind: input, shape index: {}]   ;;  %s1135_s5 = inlined_call_operand.vmem [shape: f32[1,128], index: 5, kind: input, shape index: {}]   ;;  %s1136_s6 = inlined_call_operand.vmem [shape: f32[32,8], index: 6, kind: input, shape index: {}]   ;;  %s1137_s7 = inlined_call_operand.vmem [shape: f32[1,8], index: 7, kind: input, shape index: {}]   ;;  %s1138_s8 = inlined_call_operand.vmem [shape: f32[16,8], index: 8, kind: output, shape index: {0}]   ;;  %s1139_s9 = inlined_call_operand.hbm [shape: f32[2,32], index: 9, kind: output, shape index: {1}]   ;;  %s1140_s10 = inlined_call_operand.hbm [shape: f32[2,32], index: 10, kind: output, shape index: {2}]  }
   0x1   :  { %v950_v0 = vld [vmem:[%s1134_s4 + $0x18] sm:$0xff]  ;;  %v955_v1 = vld [vmem:[%s1134_s4 + $0x10] sm:$0xff]  ;;  %v36_v2 = vld [vmem:[%s1133_s3] sm:$0xff] }
   0x2   :  { %93 = vmatpush.msra.mxu1 %v950_v0  ;;  %63 = vmatpush.msra.mxu0 %v36_v2  ;;  %v34_v3 = vld [vmem:[%s1130_s0] sm:$0xff]  ;;  %v967_v4 = vld [vmem:[%s1134_s4 + $0x8] sm:$0xff] }
   0x3   :  { %744 = vmatmul.msk.f32.vlgmr.msra.gmra.mxu0 %vm41_vm0, %v34_v3  ;;  %163 = vmatpush.msra.mxu3 %v950_v0 }
   0x4   :  { %94 = vmatpush.msra.mxu1 %v955_v1  ;;  %388 = vmatpush.msra.mxu2 %v950_v0 }
   0x5   :  { %17 = vsyncpa [#allocation6], 0  ;;  %v976_v5 = vld [vmem:[%s1134_s4] sm:$0xff]  ;;  %164 = vmatpush.msra.mxu3 %v955_v1  ;;  %530 = vmatpush.msrb.mxu0 %v950_v0  ;;  %vm77_vm1 = vcmask 261120   ;;  %s887_s26 = smov 64   ;;  %s888_s29 = smov 32  }
   0x6   :  { %95 = vmatpush.msra.mxu1 %v967_v4  ;;  %v75_v6 = vld [vmem:[%s1131_s1] sm:$0x3]  ;;  %389 = vmatpush.msra.mxu2 %v955_v1  ;;  %vm147_vm6 = vcmask 254976   ;;  %s717_s21 = sshll.u32 %s1139_s9, 4  ;;  %s891_s22 = smov [#allocation5]   ;;  %s718_s21 = int_to_ptr.hbm [resolvable:$true] %s717_s21 }
   0x7   :  { %165 = vmatpush.msra.mxu3 %v967_v4  ;;  %531 = vmatpush.msrb.mxu0 %v955_v1  ;;  %v1009_v7 = vld [vmem:[%s1135_s5] ss:$0 sm:$0xff]  ;;  %s726_s3 = sshll.u32 %s891_s22, 4  ;;  %s728_s25 = sshll.u32 %s1140_s10, 4  ;;  %s727_s3 = int_to_ptr.vmem [resolvable:$true] %s726_s3  ;;  %s729_s25 = int_to_ptr.hbm [resolvable:$true] %s728_s25 }
   0x8   :  { %96 = vmatpush.msra.mxu1 %v976_v5  ;;  %390 = vmatpush.msra.mxu2 %v967_v4  ;;  %v76_v13 = vld [vmem:[%s1132_s2] sm:$0x3] }
   0x9   :  { %746 = vmatmul.msk.f32.vlgmr.msra.gmra.mxu1 %vm77_vm1, %v75_v6  ;;  %166 = vmatpush.msra.mxu3 %v976_v5 }
   0xa   :  { %313 = vmatpush.msrb.mxu1 %v950_v0  ;;  %391 = vmatpush.msra.mxu2 %v976_v5 }
   0xb   :  { %238 = vmatpush.msrb.mxu3 %v950_v0  ;;  %532 = vmatpush.msrb.mxu0 %v967_v4 }
   0xc   :  { %314 = vmatpush.msrb.mxu1 %v955_v1 }
   0xd   :  { %239 = vmatpush.msrb.mxu3 %v955_v1  ;;  %533 = vmatpush.msrb.mxu0 %v976_v5 }
   0xe   :  { %315 = vmatpush.msrb.mxu1 %v967_v4 }
   0xf   :  { %240 = vmatpush.msrb.mxu3 %v967_v4 }
  0x10   :  { %316 = vmatpush.msrb.mxu1 %v976_v5 }
  0x11   :  { %241 = vmatpush.msrb.mxu3 %v976_v5 }
  0x12   :  { %604 = vmatpush.msra.mxu1 %v950_v0 }
  0x14   :  { %605 = vmatpush.msra.mxu1 %v955_v1 }
  0x16   :  { %606 = vmatpush.msra.mxu1 %v967_v4 }
  0x18   :  { %607 = vmatpush.msra.mxu1 %v976_v5 }
  0x80   :  { %v65_v8 = vpop.f32.mrf.mxu0 }
  0x81   :  { %v1012_v9 = vadd.f32 %v1009_v7, %v65_v8 }
  0x86   :  { %v98_v10 = vpop.f32.mrf.mxu1 }
  0x87   :  { %v101_v11 = vadd.f32 %v98_v10, %v1012_v9 }
  0x89   :  { %771 = vtanh.f32 %v101_v11  ;;  %v747_v14 = vmul.f32 -1.442695, %v101_v11 }
  0x8b   :  { %773 = vpow2.f32 %v747_v14 }
  0x8f   :  { %v772_v12 = vpop.eup %771 }
  0x90   :  { %128 = vrot.lane.b32.xlu0 %v772_v12, %s887_s26 }
  0x91   :  { %v774_v15 = vpop.eup %773 }
  0x92   :  { %v105_v16 = vadd.f32 1.0, %v774_v15 }
  0x94   :  { %775 = vrcp.f32 %v105_v16  ;;  %v117_v22 = vand.u32 2147483648, %v105_v16  ;;  %vm111_vm3 = vweird.f32 %v105_v16  ;;  %v115_v23 = vand.u32 2147483647, %v105_v16 }
  0x96   :  { %v118_v25 = vor.u32 1.1754944e-38, %v117_v22  ;;  %vm116_vm5 = vcmp.eq.f32.partialorder %v115_v23, 8.507059e+37 }
  0x98   :  { %123 = vrot.lane.b32.xlu0 %v76_v13, %s888_s29 }
  0x9a   :  { %v776_v17 = vpop.eup %775 }
  0x9b   :  { %v107_v18 = vmul.f32 %v776_v17, %v105_v16  ;;  %vm112_vm2 = vweird.f32 %v776_v17 }
  0x9c   :  { %vm113_vm4 = vmor %vm111_vm3, %vm112_vm2 }
  0x9d   :  { %v108_v19 = vsub.f32 1.0, %v107_v18 }
  0x9f   :  { %v109_v20 = vmul.f32 %v776_v17, %v108_v19 }
  0xa1   :  { %v110_v21 = vadd.f32 %v776_v17, %v109_v20 }
  0xa3   :  { %v114_v24 = vsel %vm113_vm4, %v776_v17, %v110_v21 }
  0xa4   :  { %v119_v27 = vsel %vm116_vm5, %v118_v25, %v114_v24 }
 0x102   :  { %v129_v26 = vpop.permute.xlu0 %128 }
 0x103   :  { %v131_v28 = vmul.f32 %v129_v26, %v119_v27 }
 0x105   :  { %133 = vrot.lane.b32.xlu1 %v131_v28, %s888_s29 }
 0x10a   :  { %v124_v29 = vpop.permute.xlu0 %123 }
 0x10b   :  { %v126_v30 = vmul.f32 %v124_v29, %v119_v27 }
 0x177   :  { %v134_v31 = vpop.permute.xlu1 %133 }
 0x178   :  { %v136_v32 = vadd.f32 %v134_v31, %v126_v30 }
 0x17a   :  { %777 = vtanh.f32 %v136_v32  ;;  %v196_v56 = vrot.slane %v136_v32, 6 }
 0x180   :  { %v778_v33 = vpop.eup %777 }
 0x181   :  { %139 = vrot.lane.b32.xlu1 %v778_v33, %s887_s26 }
 0x1f3   :  { %v140_v34 = vpop.permute.xlu1 %139 }
 0x1f4   :  { %v142_v35 = vmul.f32 %v140_v34, %v119_v27 }
 0x1f6   :  { %144 = vrot.lane.b32.xlu2 %v142_v35, %s888_s29 }
 0x250   :  { %v145_v36 = vpop.permute.xlu2 %144 }
 0x251   :  { %148 = vst.msk [vmem:[#allocation2] sm:$0x3] %vm147_vm6, %v145_v36  ;;  %748 = vmatmul.msk.f32.vlgmr.msra.gmra.mxu3 %vm77_vm1, %v145_v36 }
 0x252   :  { %456 = vmatpush.msra.mxu3 %v950_v0 }
 0x254   :  { %457 = vmatpush.msra.mxu3 %v955_v1 }
 0x256   :  { %458 = vmatpush.msra.mxu3 %v967_v4 }
 0x258   :  { %459 = vmatpush.msra.mxu3 %v976_v5 }
 0x2d4   :  { %v168_v37 = vpop.f32.mrf.mxu3 }
 0x2d5   :  { %v172_v38 = vrot.slane %v168_v37, 6 }
 0x2d7   :  { %v174_v39 = vadd.f32 %v172_v38, %v1012_v9 }
 0x2d9   :  { %779 = vtanh.f32 %v174_v39  ;;  %v749_v41 = vmul.f32 -1.442695, %v174_v39 }
 0x2db   :  { %781 = vpow2.f32 %v749_v41 }
 0x2df   :  { %v780_v40 = vpop.eup %779 }
 0x2e0   :  { %200 = vrot.lane.b32.xlu2 %v780_v40, %s887_s26 }
 0x2e1   :  { %v782_v42 = vpop.eup %781 }
 0x2e2   :  { %v178_v43 = vadd.f32 1.0, %v782_v42 }
 0x2e4   :  { %783 = vrcp.f32 %v178_v43  ;;  %v190_v49 = vand.u32 2147483648, %v178_v43  ;;  %vm184_vm8 = vweird.f32 %v178_v43  ;;  %v188_v50 = vand.u32 2147483647, %v178_v43 }
 0x2e6   :  { %v191_v52 = vor.u32 1.1754944e-38, %v190_v49  ;;  %vm189_vm10 = vcmp.eq.f32.partialorder %v188_v50, 8.507059e+37 }
 0x2ea   :  { %v784_v44 = vpop.eup %783 }
 0x2eb   :  { %v180_v45 = vmul.f32 %v784_v44, %v178_v43  ;;  %vm185_vm7 = vweird.f32 %v784_v44 }
 0x2ec   :  { %vm186_vm9 = vmor %vm184_vm8, %vm185_vm7 }
 0x2ed   :  { %v181_v46 = vsub.f32 1.0, %v180_v45 }
 0x2ef   :  { %v182_v47 = vmul.f32 %v784_v44, %v181_v46 }
 0x2f1   :  { %v183_v48 = vadd.f32 %v784_v44, %v182_v47 }
 0x2f3   :  { %v187_v51 = vsel %vm186_vm9, %v784_v44, %v183_v48 }
 0x2f4   :  { %v192_v54 = vsel %vm189_vm10, %v191_v52, %v187_v51 }
 0x2f5   :  { %v198_v57 = vmul.f32 %v196_v56, %v192_v54 }
 0x33a   :  { %v201_v53 = vpop.permute.xlu2 %200 }
 0x33b   :  { %v203_v55 = vmul.f32 %v201_v53, %v192_v54 }
 0x33d   :  { %205 = vrot.lane.b32.xlu0 %v203_v55, %s888_s29 }
 0x3af   :  { %v206_v58 = vpop.permute.xlu0 %205 }
 0x3b0   :  { %v208_v59 = vadd.f32 %v206_v58, %v198_v57  ;;  %v35_v57 = vld [vmem:[%s1130_s0 + $0x8] sm:$0xff]  ;;  %s889_s0 = smov 96  }
 0x3b1   :  { %745 = vmatmul.msk.f32.gmra.mxu0 %vm41_vm0, %v35_v57 }
 0x3b2   :  { %785 = vtanh.f32 %v208_v59  ;;  %v271_v22 = vrot.slane %v208_v59, 6 }
 0x3b8   :  { %v786_v60 = vpop.eup %785 }
 0x3b9   :  { %211 = vrot.lane.b32.xlu1 %v786_v60, %s887_s26 }
 0x42b   :  { %v212_v61 = vpop.permute.xlu1 %211 }
 0x42c   :  { %v1033_v62 = vmul.f32 %v212_v61, %v192_v54 }
 0x42e   :  { %v221_v63 = vrot.slane %v1033_v62, 2  ;;  %v68_v59 = vpop.f32.mrf.mxu0 }
 0x42f   :  { %v1061_v60 = vadd.f32 %v1009_v7, %v68_v59 }
 0x430   :  { %222 = vrot.lane.b32.xlu2 %v221_v63, %s888_s29 }
 0x48a   :  { %v223_v0 = vpop.permute.xlu2 %222 }
 0x48b   :  { %750 = vmatmul.msk.f32.vlgmr.msrb.gmra.mxu3 %vm77_vm1, %v223_v0 }
 0x50e   :  { %v243_v1 = vpop.f32.mrf.mxu3 }
 0x50f   :  { %v247_v2 = vrot.slane %v243_v1, 4 }
 0x511   :  { %v249_v3 = vadd.f32 %v247_v2, %v1012_v9 }
 0x513   :  { %787 = vtanh.f32 %v249_v3  ;;  %v751_v5 = vmul.f32 -1.442695, %v249_v3 }
 0x515   :  { %789 = vpow2.f32 %v751_v5 }
 0x519   :  { %v788_v4 = vpop.eup %787 }
 0x51a   :  { %275 = vrot.lane.b32.xlu0 %v788_v4, %s887_s26 }
 0x51b   :  { %v790_v6 = vpop.eup %789 }
 0x51c   :  { %v253_v8 = vadd.f32 1.0, %v790_v6 }
 0x51e   :  { %791 = vrcp.f32 %v253_v8  ;;  %v265_v15 = vand.u32 2147483648, %v253_v8  ;;  %vm259_vm12 = vweird.f32 %v253_v8  ;;  %v263_v16 = vand.u32 2147483647, %v253_v8 }
 0x520   :  { %v266_v18 = vor.u32 1.1754944e-38, %v265_v15  ;;  %vm264_vm14 = vcmp.eq.f32.partialorder %v263_v16, 8.507059e+37 }
 0x524   :  { %v792_v10 = vpop.eup %791 }
 0x525   :  { %v255_v11 = vmul.f32 %v792_v10, %v253_v8  ;;  %vm260_vm11 = vweird.f32 %v792_v10 }
 0x526   :  { %vm261_vm13 = vmor %vm259_vm12, %vm260_vm11 }
 0x527   :  { %v256_v12 = vsub.f32 1.0, %v255_v11 }
 0x529   :  { %v257_v13 = vmul.f32 %v792_v10, %v256_v12 }
 0x52b   :  { %v258_v14 = vadd.f32 %v792_v10, %v257_v13 }
 0x52d   :  { %v262_v17 = vsel %vm261_vm13, %v792_v10, %v258_v14 }
 0x52e   :  { %v267_v20 = vsel %vm264_vm14, %v266_v18, %v262_v17 }
 0x52f   :  { %v273_v23 = vmul.f32 %v271_v22, %v267_v20 }
 0x58c   :  { %v276_v19 = vpop.permute.xlu0 %275 }
 0x58d   :  { %v278_v21 = vmul.f32 %v276_v19, %v267_v20 }
 0x58f   :  { %280 = vrot.lane.b32.xlu1 %v278_v21, %s888_s29 }
 0x601   :  { %v281_v24 = vpop.permute.xlu1 %280 }
 0x602   :  { %v283_v25 = vadd.f32 %v281_v24, %v273_v23 }
 0x604   :  { %793 = vtanh.f32 %v283_v25  ;;  %v346_v49 = vrot.slane %v283_v25, 6 }
 0x60a   :  { %v794_v26 = vpop.eup %793 }
 0x60b   :  { %286 = vrot.lane.b32.xlu2 %v794_v26, %s887_s26 }
 0x665   :  { %v287_v27 = vpop.permute.xlu2 %286 }
 0x666   :  { %v1042_v28 = vmul.f32 %v287_v27, %v267_v20 }
 0x668   :  { %v296_v29 = vrot.slane %v1042_v28, 4 }
 0x66a   :  { %297 = vrot.lane.b32.xlu0 %v296_v29, %s888_s29 }
 0x6dc   :  { %v298_v30 = vpop.permute.xlu0 %297 }
 0x6dd   :  { %752 = vmatmul.msk.f32.vlgmr.msrb.gmra.mxu1 %vm77_vm1, %v298_v30 }
 0x75a   :  { %v318_v31 = vpop.f32.mrf.mxu1 }
 0x75b   :  { %v322_v32 = vrot.slane %v318_v31, 2 }
 0x75d   :  { %v324_v33 = vadd.f32 %v322_v32, %v1012_v9 }
 0x75f   :  { %795 = vtanh.f32 %v324_v33  ;;  %v753_v35 = vmul.f32 -1.442695, %v324_v33 }
 0x761   :  { %797 = vpow2.f32 %v753_v35 }
 0x765   :  { %v796_v34 = vpop.eup %795 }
 0x766   :  { %350 = vrot.lane.b32.xlu1 %v796_v34, %s887_s26 }
 0x767   :  { %v798_v36 = vpop.eup %797 }
 0x768   :  { %v328_v37 = vadd.f32 1.0, %v798_v36 }
 0x76a   :  { %799 = vrcp.f32 %v328_v37  ;;  %v340_v43 = vand.u32 2147483648, %v328_v37  ;;  %vm334_vm2 = vweird.f32 %v328_v37  ;;  %v338_v44 = vand.u32 2147483647, %v328_v37 }
 0x76c   :  { %v341_v45 = vor.u32 1.1754944e-38, %v340_v43  ;;  %vm339_vm4 = vcmp.eq.f32.partialorder %v338_v44, 8.507059e+37 }
 0x770   :  { %v800_v38 = vpop.eup %799 }
 0x771   :  { %v330_v39 = vmul.f32 %v800_v38, %v328_v37  ;;  %vm335_vm15 = vweird.f32 %v800_v38 }
 0x772   :  { %vm336_vm3 = vmor %vm334_vm2, %vm335_vm15 }
 0x773   :  { %v331_v40 = vsub.f32 1.0, %v330_v39 }
 0x775   :  { %v332_v41 = vmul.f32 %v800_v38, %v331_v40 }
 0x777   :  { %v333_v42 = vadd.f32 %v800_v38, %v332_v41 }
 0x779   :  { %v337_v9 = vsel %vm336_vm3, %v800_v38, %v333_v42 }
 0x77a   :  { %v342_v47 = vsel %vm339_vm4, %v341_v45, %v337_v9 }
 0x77b   :  { %v348_v50 = vmul.f32 %v346_v49, %v342_v47 }
 0x7d8   :  { %v351_v46 = vpop.permute.xlu1 %350 }
 0x7d9   :  { %v353_v48 = vmul.f32 %v351_v46, %v342_v47 }
 0x7db   :  { %355 = vrot.lane.b32.xlu2 %v353_v48, %s888_s29 }
 0x835   :  { %v356_v51 = vpop.permute.xlu2 %355 }
 0x836   :  { %v358_v52 = vadd.f32 %v356_v51, %v348_v50 }
 0x838   :  { %801 = vtanh.f32 %v358_v52  ;;  %v418_v17 = vrot.slane %v358_v52, 6 }
 0x83e   :  { %v802_v53 = vpop.eup %801 }
 0x83f   :  { %361 = vrot.lane.b32.xlu0 %v802_v53, %s887_s26 }
 0x8b1   :  { %v362_v54 = vpop.permute.xlu0 %361 }
 0x8b2   :  { %v1051_v55 = vmul.f32 %v362_v54, %v342_v47 }
 0x8b4   :  { %v371_v56 = vrot.slane %v1051_v55, 6 }
 0x8b6   :  { %372 = vrot.lane.b32.xlu1 %v371_v56, %s888_s29 }
 0x928   :  { %v373_v58 = vpop.permute.xlu1 %372 }
 0x929   :  { %754 = vmatmul.msk.f32.vlgmr.msra.gmra.mxu2 %vm77_vm1, %v373_v58 }
 0x9ac   :  { %v393_v61 = vpop.f32.mrf.mxu2 }
 0x9ad   :  { %v396_v63 = vadd.f32 %v393_v61, %v1061_v60 }
 0x9af   :  { %803 = vtanh.f32 %v396_v63  ;;  %v755_v1 = vmul.f32 -1.442695, %v396_v63 }
 0x9b1   :  { %805 = vpow2.f32 %v755_v1 }
 0x9b5   :  { %v804_v0 = vpop.eup %803 }
 0x9b6   :  { %422 = vrot.lane.b32.xlu2 %v804_v0, %s887_s26 }
 0x9b7   :  { %v806_v2 = vpop.eup %805 }
 0x9b8   :  { %v400_v3 = vadd.f32 1.0, %v806_v2 }
 0x9ba   :  { %807 = vrcp.f32 %v400_v3  ;;  %v412_v7 = vand.u32 2147483648, %v400_v3  ;;  %vm406_vm7 = vweird.f32 %v400_v3  ;;  %v410_v11 = vand.u32 2147483647, %v400_v3 }
 0x9bc   :  { %v413_v13 = vor.u32 1.1754944e-38, %v412_v7  ;;  %vm411_vm9 = vcmp.eq.f32.partialorder %v410_v11, 8.507059e+37 }
 0x9c0   :  { %v808_v4 = vpop.eup %807 }
 0x9c1   :  { %v402_v5 = vmul.f32 %v808_v4, %v400_v3  ;;  %vm407_vm5 = vweird.f32 %v808_v4 }
 0x9c2   :  { %vm408_vm8 = vmor %vm406_vm7, %vm407_vm5 }
 0x9c3   :  { %v403_v6 = vsub.f32 1.0, %v402_v5 }
 0x9c5   :  { %v404_v8 = vmul.f32 %v808_v4, %v403_v6 }
 0x9c7   :  { %v405_v10 = vadd.f32 %v808_v4, %v404_v8 }
 0x9c9   :  { %v409_v12 = vsel %vm408_vm8, %v808_v4, %v405_v10  ;;  %vm219_vm8 = vcmask 257026  }
 0x9ca   :  { %v414_v15 = vsel %vm411_vm9, %v413_v13, %v409_v12  ;;  %vm294_vm9 = vcmask 259076  }
 0x9cb   :  { %v420_v18 = vmul.f32 %v418_v17, %v414_v15 }
 0xa10   :  { %v423_v14 = vpop.permute.xlu2 %422 }
 0xa11   :  { %v425_v16 = vmul.f32 %v423_v14, %v414_v15 }
 0xa13   :  { %427 = vrot.lane.b32.xlu0 %v425_v16, %s888_s29 }
 0xa85   :  { %v428_v19 = vpop.permute.xlu0 %427 }
 0xa86   :  { %v430_v20 = vadd.f32 %v428_v19, %v420_v18 }
 0xa88   :  { %809 = vtanh.f32 %v430_v20  ;;  %v489_v9 = vrot.slane %v430_v20, 6 }
 0xa8e   :  { %v810_v21 = vpop.eup %809 }
 0xa8f   :  { %433 = vrot.lane.b32.xlu1 %v810_v21, %s887_s26 }
 0xb01   :  { %v434_v22 = vpop.permute.xlu1 %433 }
 0xb02   :  { %v436_v23 = vmul.f32 %v434_v22, %v414_v15 }
 0xb04   :  { %438 = vrot.lane.b32.xlu2 %v436_v23, %s888_s29 }
 0xb5e   :  { %v439_v24 = vpop.permute.xlu2 %438 }
 0xb5f   :  { %441 = vst.msk [vmem:[#allocation2 + $0x8] sm:$0x3] %vm147_vm6, %v439_v24  ;;  %756 = vmatmul.msk.f32.vlgmr.msra.gmra.mxu3 %vm77_vm1, %v439_v24 }
 0xbe2   :  { %v461_v25 = vpop.f32.mrf.mxu3 }
 0xbe3   :  { %v465_v26 = vrot.slane %v461_v25, 6 }
 0xbe5   :  { %v467_v27 = vadd.f32 %v465_v26, %v1061_v60 }
 0xbe7   :  { %811 = vtanh.f32 %v467_v27  ;;  %v757_v30 = vmul.f32 -1.442695, %v467_v27 }
 0xbe9   :  { %813 = vpow2.f32 %v757_v30 }
 0xbed   :  { %v812_v29 = vpop.eup %811 }
 0xbee   :  { %493 = vrot.lane.b32.xlu0 %v812_v29, %s887_s26 }
 0xbef   :  { %v814_v31 = vpop.eup %813 }
 0xbf0   :  { %v471_v32 = vadd.f32 1.0, %v814_v31 }
 0xbf2   :  { %815 = vrcp.f32 %v471_v32  ;;  %v483_v38 = vand.u32 2147483648, %v471_v32  ;;  %vm477_vm10 = vweird.f32 %v471_v32  ;;  %v481_v39 = vand.u32 2147483647, %v471_v32 }
 0xbf4   :  { %v484_v41 = vor.u32 1.1754944e-38, %v483_v38  ;;  %vm482_vm12 = vcmp.eq.f32.partialorder %v481_v39, 8.507059e+37 }
 0xbf8   :  { %v816_v33 = vpop.eup %815 }
 0xbf9   :  { %v473_v34 = vmul.f32 %v816_v33, %v471_v32  ;;  %vm478_vm6 = vweird.f32 %v816_v33 }
 0xbfa   :  { %vm479_vm11 = vmor %vm477_vm10, %vm478_vm6  ;;  %vm369_vm6 = vcmask 261126  }
 0xbfb   :  { %v474_v35 = vsub.f32 1.0, %v473_v34 }
 0xbfd   :  { %v475_v36 = vmul.f32 %v816_v33, %v474_v35 }
 0xbff   :  { %v476_v37 = vadd.f32 %v816_v33, %v475_v36 }
 0xc01   :  { %v480_v40 = vsel %vm479_vm11, %v816_v33, %v476_v37 }
 0xc02   :  { %v485_v43 = vsel %vm482_vm12, %v484_v41, %v480_v40 }
 0xc03   :  { %v491_v45 = vmul.f32 %v489_v9, %v485_v43 }
 0xc60   :  { %v494_v42 = vpop.permute.xlu0 %493 }
 0xc61   :  { %v496_v44 = vmul.f32 %v494_v42, %v485_v43 }
 0xc63   :  { %498 = vrot.lane.b32.xlu1 %v496_v44, %s888_s29 }
 0xcd5   :  { %v499_v46 = vpop.permute.xlu1 %498 }
 0xcd6   :  { %v501_v47 = vadd.f32 %v499_v46, %v491_v45 }
 0xcd8   :  { %817 = vtanh.f32 %v501_v47  ;;  %v563_v12 = vrot.slane %v501_v47, 6  ;;  %v670_v47 = vld [vmem:[%s1136_s6 + $0x18] sm:$0xff] }
 0xcd9   :  { %695 = vmatpush.msrb.mxu2 %v670_v47 }
 0xcde   :  { %v818_v48 = vpop.eup %817 }
 0xcdf   :  { %504 = vrot.lane.b32.xlu2 %v818_v48, %s887_s26  ;;  %v669_v48 = vld [vmem:[%s1136_s6 + $0x10] sm:$0xff] }
 0xce0   :  { %696 = vmatpush.msrb.mxu2 %v669_v48 }
 0xd39   :  { %v505_v49 = vpop.permute.xlu2 %504 }
 0xd3a   :  { %v507_v50 = vmul.f32 %v505_v49, %v485_v43  ;;  %v668_v49 = vld [vmem:[%s1136_s6 + $0x8] sm:$0xff] }
 0xd3b   :  { %697 = vmatpush.msrb.mxu2 %v668_v49 }
 0xd3c   :  { %v513_v51 = vrot.slane %v507_v50, 2 }
 0xd3e   :  { %514 = vrot.lane.b32.xlu0 %v513_v51, %s888_s29 }
 0xdb0   :  { %v515_v52 = vpop.permute.xlu0 %514 }
 0xdb1   :  { %758 = vmatmul.msk.f32.vlgmr.msrb.gmra.mxu0 %vm77_vm1, %v515_v52 }
 0xe2e   :  { %v535_v53 = vpop.f32.mrf.mxu0 }
 0xe2f   :  { %v539_v54 = vrot.slane %v535_v53, 4 }
 0xe31   :  { %v541_v56 = vadd.f32 %v539_v54, %v1061_v60 }
 0xe33   :  { %819 = vtanh.f32 %v541_v56  ;;  %v759_v58 = vmul.f32 -1.442695, %v541_v56 }
 0xe35   :  { %821 = vpow2.f32 %v759_v58 }
 0xe39   :  { %v820_v57 = vpop.eup %819 }
 0xe3a   :  { %567 = vrot.lane.b32.xlu1 %v820_v57, %s887_s26  ;;  %v770_v57 = vld [vmem:[%s1137_s7] ss:$0 sm:$0xff] }
 0xe3b   :  { %v822_v59 = vpop.eup %821 }
 0xe3c   :  { %v545_v61 = vadd.f32 1.0, %v822_v59 }
 0xe3e   :  { %823 = vrcp.f32 %v545_v61  ;;  %v557_v4 = vand.u32 2147483648, %v545_v61  ;;  %vm551_vm14 = vweird.f32 %v545_v61  ;;  %v555_v5 = vand.u32 2147483647, %v545_v61 }
 0xe40   :  { %v558_v8 = vor.u32 1.1754944e-38, %v557_v4  ;;  %vm556_vm2 = vcmp.eq.f32.partialorder %v555_v5, 8.507059e+37 }
 0xe44   :  { %v824_v63 = vpop.eup %823 }
 0xe45   :  { %v547_v0 = vmul.f32 %v824_v63, %v545_v61  ;;  %vm552_vm13 = vweird.f32 %v824_v63 }
 0xe46   :  { %vm553_vm15 = vmor %vm551_vm14, %vm552_vm13 }
 0xe47   :  { %v548_v1 = vsub.f32 1.0, %v547_v0 }
 0xe49   :  { %v549_v2 = vmul.f32 %v824_v63, %v548_v1 }
 0xe4b   :  { %v550_v3 = vadd.f32 %v824_v63, %v549_v2 }
 0xe4d   :  { %v554_v6 = vsel %vm553_vm15, %v824_v63, %v550_v3 }
 0xe4e   :  { %v559_v7 = vsel %vm556_vm2, %v558_v8, %v554_v6 }
 0xe4f   :  { %v565_v13 = vmul.f32 %v563_v12, %v559_v7 }
 0xeac   :  { %v568_v10 = vpop.permute.xlu1 %567 }
 0xead   :  { %v570_v11 = vmul.f32 %v568_v10, %v559_v7 }
 0xeaf   :  { %572 = vrot.lane.b32.xlu2 %v570_v11, %s888_s29 }
 0xf09   :  { %v573_v14 = vpop.permute.xlu2 %572 }
 0xf0a   :  { %v575_v15 = vadd.f32 %v573_v14, %v565_v13 }
 0xf0c   :  { %825 = vtanh.f32 %v575_v15  ;;  %v637_v41 = vrot.slane %v575_v15, 6 }
 0xf12   :  { %v826_v16 = vpop.eup %825 }
 0xf13   :  { %578 = vrot.lane.b32.xlu0 %v826_v16, %s887_s26 }
 0xf85   :  { %v579_v17 = vpop.permute.xlu0 %578 }
 0xf86   :  { %v581_v18 = vmul.f32 %v579_v17, %v559_v7 }
 0xf88   :  { %v587_v19 = vrot.slane %v581_v18, 4 }
 0xf8a   :  { %588 = vrot.lane.b32.xlu1 %v587_v19, %s888_s29 }
 0xffc   :  { %v589_v20 = vpop.permute.xlu1 %588 }
 0xffd   :  { %760 = vmatmul.msk.f32.vlgmr.msra.gmra.mxu1 %vm77_vm1, %v589_v20 }
0x107a   :  { %v609_v21 = vpop.f32.mrf.mxu1 }
0x107b   :  { %v613_v22 = vrot.slane %v609_v21, 2 }
0x107d   :  { %v615_v23 = vadd.f32 %v613_v22, %v1061_v60 }
0x107f   :  { %827 = vtanh.f32 %v615_v23  ;;  %v761_v25 = vmul.f32 -1.442695, %v615_v23 }
0x1081   :  { %829 = vpow2.f32 %v761_v25 }
0x1085   :  { %v828_v24 = vpop.eup %827 }
0x1086   :  { %641 = vrot.lane.b32.xlu2 %v828_v24, %s887_s26 }
0x1087   :  { %v830_v26 = vpop.eup %829 }
0x1088   :  { %v619_v27 = vadd.f32 1.0, %v830_v26 }
0x108a   :  { %831 = vrcp.f32 %v619_v27  ;;  %v631_v60 = vand.u32 2147483648, %v619_v27  ;;  %vm625_vm4 = vweird.f32 %v619_v27  ;;  %v629_v34 = vand.u32 2147483647, %v619_v27 }
0x108c   :  { %v632_v36 = vor.u32 1.1754944e-38, %v631_v60  ;;  %vm630_vm7 = vcmp.eq.f32.partialorder %v629_v34, 8.507059e+37 }
0x108e   :  { %216 = vrot.lane.b32.xlu2 %v1033_v62, %s888_s29 }
0x1090   :  { %v832_v29 = vpop.eup %831 }
0x1091   :  { %v621_v30 = vmul.f32 %v832_v29, %v619_v27  ;;  %vm626_vm3 = vweird.f32 %v832_v29 }
0x1092   :  { %vm627_vm5 = vmor %vm625_vm4, %vm626_vm3 }
0x1093   :  { %v622_v31 = vsub.f32 1.0, %v621_v30 }
0x1095   :  { %v623_v32 = vmul.f32 %v832_v29, %v622_v31 }
0x1096   :  { %509 = vrot.lane.b32.xlu2 %v507_v50, %s888_s29 }
0x1097   :  { %v624_v33 = vadd.f32 %v832_v29, %v623_v32 }
0x1099   :  { %v628_v35 = vsel %vm627_vm5, %v832_v29, %v624_v33 }
0x109a   :  { %v633_v37 = vsel %vm630_vm7, %v632_v36, %v628_v35 }
0x109b   :  { %v639_v42 = vmul.f32 %v637_v41, %v633_v37 }
0x10e0   :  { %v642_v62 = vpop.permute.xlu2 %641 }
0x10e1   :  { %v644_v38 = vmul.f32 %v642_v62, %v633_v37 }
0x10e3   :  { %646 = vrot.lane.b32.xlu0 %v644_v38, %s888_s29 }
0x10e8   :  { %v217_v39 = vpop.permute.xlu2 %216 }
0x10e9   :  { %220 = vst.msk [vmem:[#allocation2] sm:$0xc] %vm219_vm8, %v217_v39 }
0x10eb   :  { %291 = vrot.lane.b32.xlu0 %v1042_v28, %s888_s29 }
0x10f0   :  { %v510_v40 = vpop.permute.xlu2 %509 }
0x10f1   :  { %512 = vst.msk [vmem:[#allocation2 + $0x8] sm:$0xc] %vm219_vm8, %v510_v40 }
0x10f3   :  { %583 = vrot.lane.b32.xlu0 %v581_v18, %s888_s29 }
0x1155   :  { %v647_v43 = vpop.permute.xlu0 %646 }
0x1156   :  { %v649_v44 = vadd.f32 %v647_v43, %v639_v42 }
0x1158   :  { %833 = vtanh.f32 %v649_v44  ;;  %663 = vrot.lane.b32.xlu2 %v649_v44, %s889_s0 }
0x115d   :  { %v292_v9 = vpop.permute.xlu0 %291 }
0x115e   :  { %v834_v45 = vpop.eup %833  ;;  %295 = vst.msk [vmem:[#allocation2] sm:$0x30] %vm294_vm9, %v292_v9 }
0x115f   :  { %652 = vrot.lane.b32.xlu1 %v834_v45, %s887_s26 }
0x1165   :  { %v584_v46 = vpop.permute.xlu0 %583 }
0x1166   :  { %586 = vst.msk [vmem:[#allocation2 + $0x8] sm:$0x30] %vm294_vm9, %v584_v46 }
0x1167   :  { %366 = vrot.lane.b32.xlu1 %v1051_v55, %s888_s29  ;;  %v667_v55 = vld [vmem:[%s1136_s6] sm:$0xff]  ;;  %s890_s6 = smov [#allocation3]  }
0x1168   :  { %698 = vmatpush.msrb.mxu2 %v667_v55  ;;  %s715_s18 = sshll.u32 %s890_s6, 4  ;;  %s716_s18 = int_to_ptr.vmem [resolvable:$true] %s715_s18 }
0x11b2   :  { %v664_v28 = vpop.permute.xlu2 %663 }
0x11b3   :  { %666 = vst.msk [vmem:[#allocation5 - $0x6] sm:$0xc0] %vm369_vm6, %v664_v28 }
0x11b4   :  { %731 = dma.vmem_to_hbm [thread:$0]  %s727_s3, 32, %s729_s25, [#allocation6]  }
0x11d1   :  { %v653_v50 = vpop.permute.xlu1 %652 }
0x11d2   :  { %v655_v51 = vmul.f32 %v653_v50, %v633_v37 }
0x11d4   :  { %657 = vrot.lane.b32.xlu1 %v655_v51, %s888_s29 }
0x11d9   :  { %v367_v52 = vpop.permute.xlu1 %366 }
0x11da   :  { %370 = vst.msk [vmem:[#allocation2] sm:$0xc0] %vm369_vm6, %v367_v52 }
0x11e1   :  { %v671_v53 = vld [vmem:[#allocation2] sm:$0xff] }
0x11e2   :  { %762 = vmatmul.msk.f32.vlgmr.msrb.gmra.mxu2 %vm77_vm1, %v671_v53 }
0x1246   :  { %v658_v54 = vpop.permute.xlu1 %657 }
0x1247   :  { %660 = vst.msk [vmem:[#allocation2 + $0x8] sm:$0xc0] %vm369_vm6, %v658_v54 }
0x1248   :  { %661 = vst.msk [vmem:[#allocation3 - $0x6] sm:$0xc0] %vm369_vm6, %v658_v54 }
0x1249   :  { %720 = dma.vmem_to_hbm [thread:$0]  %s716_s18, 32, %s718_s21, [#allocation4]  }
0x124e   :  { %v672_v56 = vld [vmem:[#allocation2 + $0x8] sm:$0xff] }
0x124f   :  { %763 = vmatmul.msk.f32.gmra.mxu2 %vm77_vm1, %v672_v56 }
0x1265   :  { %v700_v58 = vpop.f32.mrf.mxu2 }
0x1266   :  { %v701_v59 = vadd.f32 %v770_v57, %v700_v58 }
0x1268   :  { %706 = vst.msk [vmem:[%s1138_s8] sm:$0xff] %vm41_vm0, %v701_v59 }
0x12d2   :  { %v703_v61 = vpop.f32.mrf.mxu2 }
0x12d3   :  { %v704_v63 = vadd.f32 %v770_v57, %v703_v61 }
0x12d5   :  { %707 = vst.msk [vmem:[%s1138_s8 + $0x8] sm:$0xff] %vm41_vm0, %v704_v63 }
0x12d6   :  { %883 = dma.done.wait [#allocation4], 32  }
0x12d7   :  { %884 = vsyncadd [#allocation4], 4294967264 }
0x12d8   :  { %885 = dma.done.wait [#allocation6], 32  }
0x12d9   :  { %886 = vsyncadd [#allocation6], 4294967264 }
0x12da   :  { %742 = vsyncpa [#allocation4], 1 }
0x12db   :  { %743 = vsyncpa [#allocation6], 1 }

</bundles_post_ra>
